<compile_context>
chip_gen: v7x
topology: tpu7x:2x2x1
jax: 0.10.0
libtpu: 0.0.40
codegen_flags: <defaults>
</compile_context>

<pallas_src>
import functools

import jax
import jax.numpy as jnp
from jax.experimental import pallas as pl
from jax.experimental.pallas import tpu as pltpu


def _round_down8(x: int) -> int:
    return (x // 8) * 8


def _mae_kernel(pred_ref, real_ref, sum_ref, cnt_ref, acc_sum, acc_cnt,
                *, tile_m, blocks_per_split, num_rows):
    p = pl.program_id(0)   # parallel row-range split (maps to TCs on multi-TC chips)
    i = pl.program_id(1)   # reduction over row blocks within the split

    @pl.when(i == 0)
    def _():
        acc_sum[...] = jnp.zeros_like(acc_sum)
        acc_cnt[...] = jnp.zeros_like(acc_cnt)

    # Stream native dtype; upcast to f32 in-register (free VPU filler under DMA).
    real = real_ref[...].astype(jnp.float32)
    pred = pred_ref[...].astype(jnp.float32)

    # Global (unclamped) block index -> mask rows past the end of the matrix.
    # Covers both the partial tail block and fully out-of-range padded blocks
    # (whose DMA was clamped to a valid block by the index_map).
    blk = p * blocks_per_split + i
    row0 = blk * tile_m
    row_ids = row0 + jax.lax.broadcasted_iota(jnp.int32, real.shape, 0)
    valid = row_ids < num_rows

    mask = jnp.logical_and(real != 0.0, valid)
    abs_diffs = jnp.abs(jnp.where(mask, real - pred, 0.0))
    cnt = mask.astype(jnp.int32)

    n_cols = abs_diffs.shape[-1]
    if tile_m % 8 == 0:
        # Pure VPU accumulation into vreg-shaped (8, N) buffers: split the
        # sublane-major axis and sum over the leading (vreg-index) axis.
        n_sub = tile_m // 8
        acc_sum[...] += jnp.sum(abs_diffs.reshape(n_sub, 8, n_cols), axis=0)
        acc_cnt[...] += jnp.sum(cnt.reshape(n_sub, 8, n_cols), axis=0)
    else:
        # Tiny-matrix fallback (only reachable when tile_m == M < 8).
        acc_sum[0:1, :] = acc_sum[0:1, :] + jnp.sum(abs_diffs, axis=0, keepdims=True)
        acc_cnt[0:1, :] = acc_cnt[0:1, :] + jnp.sum(cnt, axis=0, keepdims=True)

    @pl.when(i == pl.num_programs(1) - 1)
    def _():
        sum_ref[...] = acc_sum[...][None]
        cnt_ref[...] = acc_cnt[...][None]


def loss_mae(pred: jax.Array, real: jax.Array, *, tile_m: int | None = None,
             num_splits: int | None = None) -> jax.Array:
    assert pred.shape == real.shape and pred.ndim == 2
    M, N = pred.shape
    itemsize = max(pred.dtype.itemsize, real.dtype.itemsize)

    if tile_m is None:
        # 2 inputs x 2 pipeline buffers of (tile_m, N) under a budget that is
        # safe on v5e (16 MiB scoped default), v6e (32/128 MiB), v7x (32/64 MiB).
        pipeline_budget = 12 * 1024 * 1024
        max_rows = pipeline_budget // (4 * N * itemsize)
        tile_m = min(2048, max(8, max_rows))
    if M >= 8:
        tile_m = max(8, min(_round_down8(tile_m), _round_down8(M)))
    else:
        tile_m = M  # block equal to full dim is always a legal block shape

    num_blocks = pl.cdiv(M, tile_m)
    if num_splits is None:
        # v7x has 2 TensorCores; the extra loop level is harmless on v5e/v6e.
        num_splits = 2 if num_blocks >= 2 else 1
    num_splits = max(1, min(num_splits, num_blocks))
    bps = pl.cdiv(num_blocks, num_splits)

    def in_map(p, i):
        # Clamp so padded grid points re-read a valid block; their contribution
        # is zeroed in the kernel via the unclamped global row index.
        return (jnp.minimum(p * bps + i, num_blocks - 1), 0)

    kernel = functools.partial(
        _mae_kernel, tile_m=tile_m, blocks_per_split=bps, num_rows=M)

    out_sum, out_cnt = pl.pallas_call(
        kernel,
        out_shape=(
            jax.ShapeDtypeStruct((num_splits, 8, N), jnp.float32),
            jax.ShapeDtypeStruct((num_splits, 8, N), jnp.int32),
        ),
        grid_spec=pltpu.PrefetchScalarGridSpec(
            num_scalar_prefetch=0,
            grid=(num_splits, bps),
            in_specs=[
                pl.BlockSpec((tile_m, N), in_map),
                pl.BlockSpec((tile_m, N), in_map),
            ],
            out_specs=(
                pl.BlockSpec((1, 8, N), lambda p, i: (p, 0, 0)),
                pl.BlockSpec((1, 8, N), lambda p, i: (p, 0, 0)),
            ),
            scratch_shapes=[
                pltpu.VMEM((8, N), jnp.float32),  # per-lane running sum(|diffs|)
                pltpu.VMEM((8, N), jnp.int32),    # per-lane running nonzero count
            ],
        ),
        compiler_params=pltpu.CompilerParams(
            dimension_semantics=("parallel", "arbitrary"),
            vmem_limit_bytes=32 * 1024 * 1024,
        ),
    )(pred, real)

    total_sum = jnp.sum(out_sum)
    total_cnt = jnp.sum(out_cnt).astype(jnp.float32)
    return total_sum / total_cnt


def loss_mae_ref(pred, real):
    mask = real != 0.0
    diffs = jnp.where(mask, real - pred, 0.0)
    n = jnp.sum(mask.astype(jnp.float32))
    return jnp.sum(jnp.abs(diffs)) / n


if __name__ == "__main__":
    key = jax.random.PRNGKey(0)
    k1, k2, k3 = jax.random.split(key, 3)

    M, N = 300, 128  # small rating matrix; M deliberately not a multiple of 8
    pred = jax.random.uniform(k1, (M, N), dtype=jnp.float32, minval=0.0, maxval=5.0)
    ratings = jax.random.uniform(k2, (M, N), dtype=jnp.float32, minval=1.0, maxval=5.0)
    keep = jax.random.uniform(k3, (M, N)) > 0.6  # sparse observed entries
    real = jnp.where(keep, ratings, 0.0)

    ref = loss_mae_ref(pred, real)

    # Default (large) tiles: single row block, masked tail rows.
    mae_default = jax.block_until_ready(loss_mae(pred, real))
    # Small tiles: multi-block reduction, 2-way split, clamped padded grid points.
    mae_tiled = jax.block_until_ready(loss_mae(pred, real, tile_m=64))
    # Native bf16 streaming with in-kernel f32 accumulation.
    pred_bf, real_bf = pred.astype(jnp.bfloat16), real.astype(jnp.bfloat16)
    mae_bf16 = jax.block_until_ready(loss_mae(pred_bf, real_bf))
    ref_bf16 = loss_mae_ref(pred_bf.astype(jnp.float32), real_bf.astype(jnp.float32))

    assert jnp.allclose(mae_default, ref, rtol=1e-5, atol=1e-5), (mae_default, ref)
    assert jnp.allclose(mae_tiled, ref, rtol=1e-5, atol=1e-5), (mae_tiled, ref)
    assert jnp.allclose(mae_bf16, ref_bf16, rtol=1e-4, atol=1e-4), (mae_bf16, ref_bf16)
    print("KERNEL_OK")
</pallas_src>

<mosaic_0001>
module attributes {stable_mosaic.version = 11 : i64} {
  func.func @_mae_kernel(%arg0: i32, %arg1: i32, %arg2: memref<296x128xf32, #tpu.memory_space<vmem>>, %arg3: memref<296x128xf32, #tpu.memory_space<vmem>>, %arg4: memref<1x8x128xf32, #tpu.memory_space<vmem>>, %arg5: memref<1x8x128xi32, #tpu.memory_space<vmem>>, %arg6: memref<8x128xf32, #tpu.memory_space<vmem>>, %arg7: memref<8x128xi32, #tpu.memory_space<vmem>>) attributes {dimension_semantics = [#tpu.dimension_semantics<parallel>, #tpu.dimension_semantics<arbitrary>], iteration_bounds = array<i64: 2, 1>, scalar_prefetch = 0 : i64, scratch_operands = 2 : i64, tpu.core_type = #tpu.core_type<tc>, window_params = [{transform_indices = @transform_0, window_bounds = array<i64: 296, 128>}, {transform_indices = @transform_1, window_bounds = array<i64: 296, 128>}, {transform_indices = @transform_2, window_bounds = array<i64: 1, 8, 128>}, {transform_indices = @transform_3, window_bounds = array<i64: 1, 8, 128>}]} {
    %c0_i32 = arith.constant 0 : i32
    %0 = arith.cmpi eq, %arg1, %c0_i32 : i32
    %1 = arith.extui %0 : i1 to i32
    %c0_i32_0 = arith.constant 0 : i32
    %2 = arith.cmpi ne, %1, %c0_i32_0 : i32
    scf.if %2 {
      %cst_17 = arith.constant 0.000000e+00 : f32
      %34 = vector.broadcast %cst_17 : f32 to vector<8x128xf32>
      %c0_18 = arith.constant 0 : index
      %c0_19 = arith.constant 0 : index
      %35 = vector.load %arg6[%c0_18, %c0_19] : memref<8x128xf32, #tpu.memory_space<vmem>>, vector<8x128xf32>
      tpu.vector_store %arg6[%c0_18, %c0_19], %34 {strides = array<i32>} : memref<8x128xf32, #tpu.memory_space<vmem>>, vector<8x128xf32>,
      %c0_i32_20 = arith.constant 0 : i32
      %36 = vector.broadcast %c0_i32_20 : i32 to vector<8x128xi32>
      %c0_21 = arith.constant 0 : index
      %c0_22 = arith.constant 0 : index
      %37 = vector.load %arg7[%c0_21, %c0_22] : memref<8x128xi32, #tpu.memory_space<vmem>>, vector<8x128xi32>
      tpu.vector_store %arg7[%c0_21, %c0_22], %36 {strides = array<i32>} : memref<8x128xi32, #tpu.memory_space<vmem>>, vector<8x128xi32>,
    } else {
    }
    %c0 = arith.constant 0 : index
    %c0_1 = arith.constant 0 : index
    %3 = vector.load %arg3[%c0, %c0_1] : memref<296x128xf32, #tpu.memory_space<vmem>>, vector<296x128xf32>
    %c0_2 = arith.constant 0 : index
    %c0_3 = arith.constant 0 : index
    %4 = vector.load %arg2[%c0_2, %c0_3] : memref<296x128xf32, #tpu.memory_space<vmem>>, vector<296x128xf32>
    %c1_i32 = arith.constant 1 : i32
    %5 = arith.muli %arg0, %c1_i32 : i32
    %6 = arith.addi %5, %arg1 : i32
    %c296_i32 = arith.constant 296 : i32
    %7 = arith.muli %6, %c296_i32 : i32
    %8 = tpu.iota {dimensions = array<i32: 0>} : vector<296x128xi32>
    %9 = vector.broadcast %7 : i32 to vector<296x128xi32>
    %10 = arith.addi %9, %8 : vector<296x128xi32>
    %c300_i32 = arith.constant 300 : i32
    %11 = vector.broadcast %c300_i32 : i32 to vector<296x128xi32>
    %12 = arith.cmpi slt, %10, %11 : vector<296x128xi32>
    %cst = arith.constant 0.000000e+00 : f32
    %13 = vector.broadcast %cst : f32 to vector<296x128xf32>
    %14 = arith.cmpf one, %3, %13 : vector<296x128xf32>
    %15 = arith.andi %14, %12 : vector<296x128xi1>
    %16 = arith.subf %3, %4 : vector<296x128xf32>
    %cst_4 = arith.constant 0.000000e+00 : f32
    %17 = vector.broadcast %cst_4 : f32 to vector<296x128xf32>
    %18 = arith.select %15, %16, %17 : vector<296x128xi1>, vector<296x128xf32>
    %19 = math.absf %18 : vector<296x128xf32>
    %20 = arith.extui %15 : vector<296x128xi1> to vector<296x128xi32>
    %c0_5 = arith.constant 0 : index
    %c0_6 = arith.constant 0 : index
    %21 = vector.load %arg6[%c0_5, %c0_6] : memref<8x128xf32, #tpu.memory_space<vmem>>, vector<8x128xf32>
    %22 = vector.shape_cast %19 : vector<296x128xf32> to vector<37x8x128xf32>
    %cst_7 = arith.constant dense<0.000000e+00> : vector<8x128xf32>
    %23 = vector.multi_reduction <add>, %22, %cst_7 [0] : vector<37x8x128xf32> to vector<8x128xf32>
    %24 = arith.addf %21, %23 : vector<8x128xf32>
    %c0_8 = arith.constant 0 : index
    %c0_9 = arith.constant 0 : index
    %25 = vector.load %arg6[%c0_8, %c0_9] : memref<8x128xf32, #tpu.memory_space<vmem>>, vector<8x128xf32>
    tpu.vector_store %arg6[%c0_8, %c0_9], %24 {strides = array<i32>} : memref<8x128xf32, #tpu.memory_space<vmem>>, vector<8x128xf32>,
    %c0_10 = arith.constant 0 : index
    %c0_11 = arith.constant 0 : index
    %26 = vector.load %arg7[%c0_10, %c0_11] : memref<8x128xi32, #tpu.memory_space<vmem>>, vector<8x128xi32>
    %27 = vector.shape_cast %20 : vector<296x128xi32> to vector<37x8x128xi32>
    %cst_12 = arith.constant dense<0> : vector<8x128xi32>
    %28 = vector.multi_reduction <add>, %27, %cst_12 [0] : vector<37x8x128xi32> to vector<8x128xi32>
    %29 = arith.addi %26, %28 : vector<8x128xi32>
    %c0_13 = arith.constant 0 : index
    %c0_14 = arith.constant 0 : index
    %30 = vector.load %arg7[%c0_13, %c0_14] : memref<8x128xi32, #tpu.memory_space<vmem>>, vector<8x128xi32>
    tpu.vector_store %arg7[%c0_13, %c0_14], %29 {strides = array<i32>} : memref<8x128xi32, #tpu.memory_space<vmem>>, vector<8x128xi32>,
    %c0_i32_15 = arith.constant 0 : i32
    %31 = arith.cmpi eq, %arg1, %c0_i32_15 : i32
    %32 = arith.extui %31 : i1 to i32
    %c0_i32_16 = arith.constant 0 : i32
    %33 = arith.cmpi ne, %32, %c0_i32_16 : i32
    scf.if %33 {
      %c0_17 = arith.constant 0 : index
      %c0_18 = arith.constant 0 : index
      %34 = vector.load %arg6[%c0_17, %c0_18] : memref<8x128xf32, #tpu.memory_space<vmem>>, vector<8x128xf32>
      %35 = vector.shape_cast %34 : vector<8x128xf32> to vector<1x8x128xf32>
      %c0_19 = arith.constant 0 : index
      %c0_20 = arith.constant 0 : index
      %c0_21 = arith.constant 0 : index
      %36 = vector.load %arg4[%c0_19, %c0_20, %c0_21] : memref<1x8x128xf32, #tpu.memory_space<vmem>>, vector<1x8x128xf32>
      tpu.vector_store %arg4[%c0_19, %c0_20, %c0_21], %35 {strides = array<i32>} : memref<1x8x128xf32, #tpu.memory_space<vmem>>, vector<1x8x128xf32>,
      %c0_22 = arith.constant 0 : index
      %c0_23 = arith.constant 0 : index
      %37 = vector.load %arg7[%c0_22, %c0_23] : memref<8x128xi32, #tpu.memory_space<vmem>>, vector<8x128xi32>
      %38 = vector.shape_cast %37 : vector<8x128xi32> to vector<1x8x128xi32>
      %c0_24 = arith.constant 0 : index
      %c0_25 = arith.constant 0 : index
      %c0_26 = arith.constant 0 : index
      %39 = vector.load %arg5[%c0_24, %c0_25, %c0_26] : memref<1x8x128xi32, #tpu.memory_space<vmem>>, vector<1x8x128xi32>
      tpu.vector_store %arg5[%c0_24, %c0_25, %c0_26], %38 {strides = array<i32>} : memref<1x8x128xi32, #tpu.memory_space<vmem>>, vector<1x8x128xi32>,
    } else {
    }
    return
  }
  func.func @transform_0(%arg0: i32, %arg1: i32) -> (i32, i32) {
    %c1_i32 = arith.constant 1 : i32
    %0 = arith.muli %arg0, %c1_i32 : i32
    %1 = arith.addi %0, %arg1 : i32
    %c1_i32_0 = arith.constant 1 : i32
    %2 = arith.minsi %1, %c1_i32_0 : i32
    %c0_i32 = arith.constant 0 : i32
    %c0_i32_1 = arith.constant 0 : i32
    return %2, %c0_i32 : i32, i32
  }
  func.func @transform_1(%arg0: i32, %arg1: i32) -> (i32, i32) {
    %c1_i32 = arith.constant 1 : i32
    %0 = arith.muli %arg0, %c1_i32 : i32
    %1 = arith.addi %0, %arg1 : i32
    %c1_i32_0 = arith.constant 1 : i32
    %2 = arith.minsi %1, %c1_i32_0 : i32
    %c0_i32 = arith.constant 0 : i32
    %c0_i32_1 = arith.constant 0 : i32
    return %2, %c0_i32 : i32, i32
  }
  func.func @transform_2(%arg0: i32, %arg1: i32) -> (i32, i32, i32) {
    %c0_i32 = arith.constant 0 : i32
    %c0_i32_0 = arith.constant 0 : i32
    %c0_i32_1 = arith.constant 0 : i32
    return %arg0, %c0_i32, %c0_i32_0 : i32, i32, i32
  }
  func.func @transform_3(%arg0: i32, %arg1: i32) -> (i32, i32, i32) {
    %c0_i32 = arith.constant 0 : i32
    %c0_i32_0 = arith.constant 0 : i32
    %c0_i32_1 = arith.constant 0 : i32
    return %arg0, %c0_i32, %c0_i32_0 : i32, i32, i32
  }
}

</mosaic_0001>

<bundles_post_ra>
// kernel: tpu_custom_call.1
= control target key start
LH: loop header
LB: loop body
LE: loop exit
PB: predicated region body
PF: predicated region fallthrough
CT: control target
= control target key end

     0   :  { %9 = vsyncpa [#allocation5], 0  ;;  %s2434_s0 = inlined_call_operand.hbm [shape: f32[300,128], index: 0, kind: input, shape index: {}]   ;;  %s2435_s1 = inlined_call_operand.hbm [shape: f32[300,128], index: 1, kind: input, shape index: {}]   ;;  %s2436_s2 = inlined_call_operand.hbm [shape: f32[2,8,128], index: 2, kind: output, shape index: {0}]   ;;  %s2437_s3 = inlined_call_operand.hbm [shape: s32[2,8,128], index: 3, kind: output, shape index: {1}]  }
   0x1   :  { %11 = vsyncpa [#allocation5 + $0x1], 0 }
   0x2   :  { %12 = vsyncpa [#allocation8], 0 }
   0x3   :  { %14 = vsyncpa [#allocation8 + $0x1], 0 }
   0x4   :  { %15 = vsyncpa [#allocation6], 0 }
   0x5   :  { %17 = vsyncpa [#allocation6 + $0x1], 0 }
   0x6   :  { %18 = vsyncpa [#allocation11], 0 }
   0x7   :  { %20 = vsyncpa [#allocation11 + $0x1], 0  ;;  %s1313_s12 = smov 0   ;;  %s1315_s13 = smov 0  }
   0x8   :  { %s1317_s14 = smov 0   ;;  %s1319_s15 = smov 0  }
   0x9   :  { %s1321_s16 = smov 0   ;;  %s1323_s17 = smov 0  }
   0xa   :  { %s1325_s18 = smov 0   ;;  %s1327_s19 = smov 0  }
   0xb   :  { %s1329_s20 = smov 0  }
   0xc LB: > { %2466 = sst [smem:[#allocation16_spill]] %s1278_s19  ;;  %s965_s21 = sadd.s32 4294967295, %s1282_s20   ;;  %s1282_s20 = sphi %s1329_s20, %s26_s20   ;;  %s1278_s19 = sphi %s1327_s19, %s2633_s19   ;;  %s1274_s18 = sphi %s1325_s18, %s2632_s18   ;;  %s1270_s17 = sphi %s1323_s17, %s2639_s17   ;;  %s1266_s16 = sphi %s1321_s16, %s2638_s16   ;;  %s1262_s15 = sphi %s1319_s15, %s2637_s15   ;;  %s1258_s14 = sphi %s1317_s14, %s2636_s14   ;;  %s1254_s13 = sphi %s1315_s13, %s2635_s13   ;;  %s1250_s12 = sphi %s1313_s12, %s2634_s12  }
   0xd   : > { %s966_s22 = sadd.s32 4294967294, %s1282_s20   ;;  %s38_s23 = sadd.s32 1, %s1278_s19 }
   0xe   : > { %p43_p0 = scmp.lt.s32.totalorder %s1278_s19, 1  ;;  %p40_p1 = scmp.ge.s32.totalorder %s38_s23, 2 }
   0xf   : > { %s51_s24 = sadd.s32 1, %s1270_s17  ;;  %p58_p2 = scmp.ne.s32.totalorder %s1270_s17, %s1266_s16 }
  0x10   : > { %s1362_s25 = scalar_select %p43_p0, %s1278_s19, 1 }
  0x11   : > { %s2641_s23 = smov (%p40_p1, %s38_s23), 0  ;;  %p59_p3 = scmp.eq.s32.totalorder %s1282_s20, 0 }
  0x12   : > { %2467 = sst [smem:[#allocation17_spill]] %s2641_s23  ;;  %p46_p4 = scmp.lt.s32.totalorder %s2641_s23, 1 }
  0x13   : > { %p64_p5 = scmp.ne.s32.totalorder %s1266_s16, %s1262_s15  ;;  %p1371_p6 = por %p59_p3, %p58_p2 }
  0x14   : > { %p65_p7 = scmp.eq.s32.totalorder %s965_s21, 0  ;;  %s106_s29 = ssub.s32 %s1278_s19, %s2641_s23 }
  0x15   : > { %s47_s27 = scalar_select %p46_p4, %s2641_s23, 1 }
  0x16   : > { %p1376_p8 = por %p65_p7, %p64_p5  ;;  %p107_p9 = scmp.eq.s32.totalorder %s106_s29, 0 }
  0x17   : > { %s48_s30 = ssub.s32 %s1362_s25, %s47_s27  ;;  %s109_s4 = sadd.s32 1, %s1258_s14 }
  0x18   : > { %p49_p10 = scmp.eq.s32.totalorder %s48_s30, 0  ;;  %p119_p11 = scmp.ne.s32.totalorder %s1258_s14, %s1254_s13 }
  0x19   : > { %s1385_s5 = scalar_select %p107_p9, %s1258_s14, %s109_s4  }
  0x1a   : > { %s1388_s6 = scalar_select %p49_p10, %s1270_s17, %s51_s24  }
  0x1b   : > { %p120_p12 = scmp.eq.s32.totalorder %s965_s21, 1  ;;  %p125_p13 = scmp.ne.s32.totalorder %s1254_s13, %s1250_s12 }
  0x1c   : > { %p126_p0 = scmp.eq.s32.totalorder %s966_s22, 1  ;;  %p2440_p3 = scmp.ge.s32.totalorder %s1282_s20, 2 }
  0x1d   : > { %p1394_p1 = por %p120_p12, %p119_p11 }
  0x1e   : > { %p1398_p2 = por %p126_p0, %p125_p13  ;;  %168 = sbr.rel (%p2440_p3) target bundleno = 107 (0x6b), region = 16 }
  0x1f   : > { %s2470_s7 = scalar_select %p1394_p1, 1, 0 }
  0x20   : > { %s2471_s8 = scalar_select %p1398_p2, 1, 0 }
  0x25   : > { %171 = sbr.rel (!%p1371_p6) target bundleno = 72 (0x48), region = 20  ;;  %s172_s9 = sand.u32 (%p1371_p6), 1, %s1270_s17  }
  0x26   : > { %s180_s10 = smul.u32 (%p1371_p6), 37, %s1362_s25  ;;  %s1412_s24 = scalar_lea.sflag (%p1371_p6), [#allocation5], %s172_s9 }
  0x27   : > { %s990_s11 = smul.u32 (%p1371_p6), 296, %s172_s9 }
  0x28   : > { %s181_s15 = ssub.s32 (%p1371_p6), 38, %s180_s10 }
  0x29   : > { %p182_p4 = scmp.lt.s32.totalorder (%p1371_p6), %s181_s15, 37  ;;  %s176_s27 = scalar_lea.vmem (%p1371_p6), [#allocation4], %s990_s11 }
  0x2c   : > { %s2643_s15 = smov (!%p182_p4, %s181_s15), 37 }
  0x2d   : > { %s1409_s21 = sshll.u32 %s2643_s15, 7 }
  0x2e   : > { %s186_s22 = ssub.s32 4736, %s1409_s21 }
  0x2f   : > { %187 = vsyncadd %s1412_s24, %s186_s22  ;;  %p970_p5 = scmp.ne.s32.totalorder %s1409_s21, 0  ;;  %s988_s29 = smul.u32 4736, %s1362_s25 }
  0x30   : > { %s192_s30 = sshll.u32 %s176_s27, 4  ;;  %s1088_s22 = scalar_lea.hbm %s2434_s0, 4864  ;;  %s1422_s30 = int_to_ptr.vmem [resolvable:$true] %s192_s30 }
  0x31   : > { %s1420_s23 = scalar_lea.hbm %s2434_s0, %s988_s29 }
  0x32   : > { %s1084_s9 = scalar_lea.hbm %s1420_s23, %s1409_s21  ;;  %p1089_p11 = scmp.lt.u32.totalorder %s1420_s23, %s2434_s0 }
  0x33   : > { %p1085_p7 = scmp.ne.s32.totalorder %s1420_s23, %s1084_s9  ;;  %p1090_p12 = scmp.lt.u32.totalorder %s1088_s22, %s1084_s9 }
  0x34   : > { %p1092_p0 = scmp.lt.u32.totalorder %s1084_s9, %s1420_s23 }
  0x35   : > { %p1086_p9 = pnand %p1085_p7, %p970_p5  ;;  %p1091_p13 = por %p1090_p12, %p1089_p11 }
  0x37   : > { %p1087_p10 = pneg %p1086_p9  ;;  %p1093_p4 = por %p1092_p0, %p1091_p13 }
  0x39   : > { %p1094_p3 = pnand %p1093_p4, %p1087_p10 }
  0x3b   : > { %1097 = shalt.err (!%p1094_p3)
}
  0x3c   : > { %s1098_s29 = scalar_lea.vmem %s1422_s30, %s1409_s21  ;;  %s1284_s4 = smov [#allocation4]  }
  0x3d   : > { %p1099_p7 = scmp.ne.s32.totalorder %s1422_s30, %s1098_s29  ;;  %s1102_s10 = sshll.u32 %s1284_s4, 4  ;;  %s1103_s10 = int_to_ptr.vmem [resolvable:$false] %s1102_s10 }
  0x3e   : > { %s1104_s19 = scalar_lea.vmem %s1103_s10, 9472  ;;  %p1105_p1 = scmp.lt.s32.totalorder %s1422_s30, %s1103_s10 }
  0x3f   : > { %p1100_p9 = pnand %p1099_p7, %p970_p5  ;;  %p1106_p11 = scmp.lt.s32.totalorder %s1104_s19, %s1098_s29 }
  0x41   : > { %p1101_p2 = pneg %p1100_p9  ;;  %p1107_p12 = por %p1106_p11, %p1105_p1 }
  0x43   : > { %p1108_p13 = pnand %p1107_p12, %p1101_p2 }
  0x45   : > { %1111 = shalt.err (!%p1108_p13)
}
  0x46   : > { %s1285_s9 = smov 128   ;;  %s1286_s11 = smov 8  }
  0x47   : > { %198 = dma.hbm_to_vmem [thread:$0]  (%p970_p5), %s1420_s23, %s1409_s21, %s1422_s30, %s1412_s24, %s1285_s9, %s1285_s9, %s1286_s11  }
  0x48 PF: > { %201 = sbr.rel (!%p1371_p6) target bundleno = 107 (0x6b), region = 24  ;;  %s202_s15 = sand.u32 (%p1371_p6), 1, %s1270_s17  }
  0x49   : > { %s210_s22 = smul.u32 (%p1371_p6), 37, %s1362_s25  ;;  %s1456_s19 = scalar_lea.sflag (%p1371_p6), [#allocation8], %s202_s15 }
  0x4a   : > { %s991_s27 = smul.u32 (%p1371_p6), 296, %s202_s15 }
  0x4b   : > { %s211_s29 = ssub.s32 (%p1371_p6), 38, %s210_s22 }
  0x4c   : > { %p212_p1 = scmp.lt.s32.totalorder (%p1371_p6), %s211_s29, 37  ;;  %s206_s23 = scalar_lea.vmem (%p1371_p6), [#allocation7], %s991_s27 }
  0x4f   : > { %s2645_s29 = smov (!%p212_p1, %s211_s29), 37 }
  0x50   : > { %s1453_s4 = sshll.u32 %s2645_s29, 7 }
  0x51   : > { %s216_s10 = ssub.s32 4736, %s1453_s4 }
  0x52   : > { %217 = vsyncadd %s1456_s19, %s216_s10  ;;  %p975_p6 = scmp.ne.s32.totalorder %s1453_s4, 0  ;;  %s989_s26 = smul.u32 4736, %s1362_s25 }
  0x53   : > { %s222_s21 = sshll.u32 %s206_s23, 4  ;;  %s1116_s25 = scalar_lea.hbm %s2435_s1, 4864  ;;  %s1466_s21 = int_to_ptr.vmem [resolvable:$true] %s222_s21 }
  0x54   : > { %s1464_s9 = scalar_lea.hbm %s2435_s1, %s989_s26 }
  0x55   : > { %s1112_s11 = scalar_lea.hbm %s1464_s9, %s1453_s4  ;;  %p1117_p10 = scmp.lt.u32.totalorder %s1464_s9, %s2435_s1 }
  0x56   : > { %p1113_p2 = scmp.ne.s32.totalorder %s1464_s9, %s1112_s11  ;;  %p1118_p0 = scmp.lt.u32.totalorder %s1116_s25, %s1112_s11 }
  0x57   : > { %p1120_p7 = scmp.lt.u32.totalorder %s1112_s11, %s1464_s9 }
  0x58   : > { %p1114_p3 = pnand %p1113_p2, %p975_p6  ;;  %p1119_p4 = por %p1118_p0, %p1117_p10 }
  0x5a   : > { %p1115_p5 = pneg %p1114_p3  ;;  %p1121_p9 = por %p1120_p7, %p1119_p4 }
  0x5c   : > { %p1122_p11 = pnand %p1121_p9, %p1115_p5 }
  0x5e   : > { %1125 = shalt.err (!%p1122_p11)
}
  0x5f   : > { %s1126_s10 = scalar_lea.vmem %s1466_s21, %s1453_s4  ;;  %s1287_s23 = smov [#allocation7]  }
  0x60   : > { %p1127_p12 = scmp.ne.s32.totalorder %s1466_s21, %s1126_s10  ;;  %s1130_s26 = sshll.u32 %s1287_s23, 4  ;;  %s1131_s26 = int_to_ptr.vmem [resolvable:$false] %s1130_s26 }
  0x61   : > { %s1132_s24 = scalar_lea.vmem %s1131_s26, 9472  ;;  %p1133_p2 = scmp.lt.s32.totalorder %s1466_s21, %s1131_s26 }
  0x62   : > { %p1128_p13 = pnand %p1127_p12, %p975_p6  ;;  %p1134_p3 = scmp.lt.s32.totalorder %s1132_s24, %s1126_s10 }
  0x64   : > { %p1129_p1 = pneg %p1128_p13  ;;  %p1135_p10 = por %p1134_p3, %p1133_p2 }
  0x66   : > { %p1136_p0 = pnand %p1135_p10, %p1129_p1 }
  0x68   : > { %1139 = shalt.err (!%p1136_p0)
}
  0x69   : > { %s1288_s30 = smov 128   ;;  %s1289_s11 = smov 8  }
  0x6a   : > { %228 = dma.hbm_to_vmem [thread:$0]  (%p975_p6), %s1464_s9, %s1453_s4, %s1466_s21, %s1456_s19, %s1288_s30, %s1288_s30, %s1289_s11  }
  0x6b PF: > { %p979_p5 = scmp.ge.s32.totalorder %s1282_s20, 1  ;;  %p230_p4 = scmp.lt.s32.totalorder %s1282_s20, 3 }
  0x6d   : > { %p231_p7 = pnand %p979_p5, %p230_p4 }
  0x6f   : > { %234 = sbr.rel (%p231_p7) target bundleno = 271 (0x10f), region = 28 }
  0x76   : > { %s236_s15 = sand.u32 1, %s1266_s16  }
  0x77   : > { %s992_s22 = smul.u32 296, %s236_s15  ;;  %s237_s25 = scalar_lea.sflag [#allocation5], %s236_s15 }
  0x79   : > { %s1496_s27 = scalar_lea.vmem [#allocation4], %s992_s22 }
  0x7a   : > { %1233 = dma.done.wait (%p1376_p8), %s237_s25, 4736  }
  0x7b   : > { %1235 = vsyncadd (%p1376_p8), %s237_s25, 4294962560  ;;  %s246_s4 = scalar_lea.sflag [#allocation8], %s236_s15  ;;  %s1502_s19 = scalar_lea.vmem [#allocation7], %s992_s22 }
  0x7c   : > { %1237 = dma.done.wait (%p1376_p8), %s246_s4, 4736  }
  0x7d   : > { %1239 = vsyncadd (%p1376_p8), %s246_s4, 4294962560  ;;  %v380_v0 = vlaneseq  ;;  %s379_s21 = smul.u32 296, %s1274_s18  ;;  %v1545_v52 = vld [vmem:[%s1502_s19 + $0x40] sm:$0xff]  ;;  %v1560_v57 = vld [vmem:[%s1502_s19 + $0x48] sm:$0xff]  ;;  %s2265_s28 = sand.u32 1, %s1254_s13  }
  0x7e   : > { %v1575_v62 = vld [vmem:[%s1502_s19] sm:$0xff]  ;;  %vm501_vm1 = vcmp.ne.f32.partialorder %v1545_v52, 0.0  ;;  %vm502_vm3 = vcmp.ne.f32.partialorder %v1560_v57, 0.0  ;;  %s980_s9 = sshll.u32 %s2265_s28, 3  ;;  %s984_s29 = sshll.u32 %s1274_s18, 7 }
  0x7f   : > { %v381_v1 = vshrl.u32 %v380_v0, 7  ;;  %v1509_v3 = vstv %s379_s21  ;;  %vm493_vm5 = vcmp.ne.f32.partialorder %v1575_v62, 0.0  ;;  %s281_s10 = scalar_lea.vmem [#allocation10], %s980_s9  ;;  %s2324_s30 = scalar_lea.hbm %s2437_s3, %s984_s29 }
  0x80   : > { %s832_s23 = sshll.u32 %s281_s10, 4  ;;  %s806_s11 = scalar_lea.sflag [#allocation11], %s2265_s28  ;;  %s2326_s23 = int_to_ptr.vmem [resolvable:$true] %s832_s23 }
  0x81   : > { %v382_v2 = vadd.s32 8, %v381_v1  ;;  %v383_v4 = vadd.s32 16, %v381_v1  ;;  %v384_v5 = vadd.s32 24, %v381_v1  ;;  %v385_v6 = vadd.s32 32, %v381_v1  ;;  %s1140_s15 = scalar_lea.vmem %s2326_s23, 128  ;;  %p2629_p6 = scmp.ne.s32.totalorder %s2470_s7, 0 }
  0x82   : > { %v386_v7 = vadd.s32 40, %v381_v1  ;;  %v387_v8 = vadd.s32 48, %v381_v1  ;;  %v388_v9 = vadd.s32 56, %v381_v1  ;;  %v389_v10 = vadd.s32 64, %v381_v1  ;;  %p1141_p8 = scmp.ne.s32.totalorder %s2326_s23, %s1140_s15  ;;  %s1291_s22 = smov [#allocation10]  }
  0x83   : > { %v390_v11 = vadd.s32 72, %v381_v1  ;;  %v391_v12 = vadd.s32 80, %v381_v1  ;;  %v392_v13 = vadd.s32 88, %v381_v1  ;;  %v393_v14 = vadd.s32 96, %v381_v1  ;;  %s1144_s25 = sshll.u32 %s1291_s22, 4  ;;  %s1145_s25 = int_to_ptr.vmem [resolvable:$false] %s1144_s25 }
  0x84   : > { %v394_v15 = vadd.s32 104, %v381_v1  ;;  %v395_v16 = vadd.s32 112, %v381_v1  ;;  %v396_v17 = vadd.s32 120, %v381_v1  ;;  %v397_v18 = vadd.s32 128, %v381_v1  ;;  %p1142_p9 = pnand %p1141_p8, %p2629_p6  ;;  %s1146_s4 = scalar_lea.vmem %s1145_s25, 256 }
  0x85   : > { %v1512_v19 = vadd.s32 %v1509_v3, %v381_v1  ;;  %v398_v20 = vadd.s32 136, %v381_v1  ;;  %v399_v21 = vadd.s32 144, %v381_v1  ;;  %v400_v22 = vadd.s32 152, %v381_v1  ;;  %p1147_p12 = scmp.lt.s32.totalorder %s2326_s23, %s1145_s25  ;;  %p1148_p13 = scmp.lt.s32.totalorder %s1146_s4, %s1140_s15 }
  0x86   : > { %v1515_v23 = vadd.s32 %v1509_v3, %v382_v2  ;;  %v401_v24 = vadd.s32 160, %v381_v1  ;;  %v402_v25 = vadd.s32 168, %v381_v1  ;;  %v403_v26 = vadd.s32 176, %v381_v1  ;;  %p1143_p11 = pneg %p1142_p9 }
  0x87   : > { %v1518_v27 = vadd.s32 %v1509_v3, %v383_v4  ;;  %v404_v28 = vadd.s32 184, %v381_v1  ;;  %v405_v29 = vadd.s32 192, %v381_v1  ;;  %v406_v30 = vadd.s32 200, %v381_v1  ;;  %v1590_v4 = vld [vmem:[%s1502_s19 + $0x50] sm:$0xff]  ;;  %p1149_p1 = por %p1148_p13, %p1147_p12 }
  0x88   : > { %v1521_v31 = vadd.s32 %v1509_v3, %v384_v5  ;;  %v407_v32 = vadd.s32 208, %v381_v1  ;;  %v408_v33 = vadd.s32 216, %v381_v1  ;;  %v409_v34 = vadd.s32 224, %v381_v1 }
  0x89   : > { %v1524_v35 = vadd.s32 %v1509_v3, %v385_v6  ;;  %v410_v36 = vadd.s32 232, %v381_v1  ;;  %v411_v37 = vadd.s32 240, %v381_v1  ;;  %v412_v38 = vadd.s32 248, %v381_v1  ;;  %p1150_p2 = pnand %p1149_p1, %p1143_p11 }
  0x8a   : > { %v1527_v39 = vadd.s32 %v1509_v3, %v386_v7  ;;  %v413_v40 = vadd.s32 256, %v381_v1  ;;  %v414_v41 = vadd.s32 264, %v381_v1  ;;  %v415_v42 = vadd.s32 272, %v381_v1  ;;  %v1600_v7 = vld [vmem:[%s1502_s19 + $0x8] sm:$0xff] }
  0x8b   : > { %v1530_v43 = vadd.s32 %v1509_v3, %v387_v8  ;;  %v416_v44 = vadd.s32 280, %v381_v1  ;;  %v417_v45 = vadd.s32 288, %v381_v1  ;;  %v1533_v46 = vadd.s32 %v1509_v3, %v388_v9 }
  0x8c   : > { %v427_v47 = vadd.s32 %v1509_v3, %v389_v10  ;;  %v428_v48 = vadd.s32 %v1509_v3, %v390_v11  ;;  %v429_v49 = vadd.s32 %v1509_v3, %v391_v12  ;;  %v1539_v50 = vadd.s32 %v1509_v3, %v392_v13  ;;  %v1610_v10 = vld [vmem:[%s1502_s19 + $0x58] sm:$0xff]  ;;  %v341_v13 = vld [vmem:[%s1496_s27] sm:$0xff] }
  0x8d   : > { %v1542_v51 = vadd.s32 %v1509_v3, %v393_v14  ;;  %v1548_v53 = vadd.s32 %v1509_v3, %v394_v15  ;;  %v1551_v54 = vadd.s32 %v1509_v3, %v395_v16  ;;  %v1554_v55 = vadd.s32 %v1509_v3, %v396_v17  ;;  %v1636_v17 = vld [vmem:[%s1502_s19 + $0x60] sm:$0xff] }
  0x8e   : > { %v1557_v56 = vadd.s32 %v1509_v3, %v397_v18  ;;  %v1563_v58 = vadd.s32 %v1509_v3, %v398_v20  ;;  %v1566_v59 = vadd.s32 %v1509_v3, %v399_v21  ;;  %v1569_v60 = vadd.s32 %v1509_v3, %v400_v22  ;;  %v342_v18 = vld [vmem:[%s1496_s27 + $0x8] sm:$0xff] }
  0x8f   : > { %v1572_v61 = vadd.s32 %v1509_v3, %v401_v24  ;;  %v1578_v63 = vadd.s32 %v1509_v3, %v402_v25  ;;  %v1581_v0 = vadd.s32 %v1509_v3, %v403_v26  ;;  %v1584_v1 = vadd.s32 %v1509_v3, %v404_v28  ;;  %v1655_v24 = vld [vmem:[%s1502_s19 + $0x10] sm:$0xff] }
  0x90   : > { %v1587_v2 = vadd.s32 %v1509_v3, %v405_v29  ;;  %v1593_v5 = vadd.s32 %v1509_v3, %v406_v30  ;;  %v1596_v6 = vadd.s32 %v1509_v3, %v407_v32  ;;  %vm464_vm0 = vcmp.lt.s32.totalorder %v427_v47, 300  ;;  %v1674_v29 = vld [vmem:[%s1502_s19 + $0x68] sm:$0xff] }
  0x91   : > { %v1603_v8 = vadd.s32 %v1509_v3, %v408_v33  ;;  %v1606_v9 = vadd.s32 %v1509_v3, %v409_v34  ;;  %vm465_vm2 = vcmp.lt.s32.totalorder %v428_v48, 300  ;;  %v1613_v11 = vadd.s32 %v1509_v3, %v410_v36  ;;  %vm1631_vm8 = vmand %vm501_vm1, %vm464_vm0  ;;  %v1690_v33 = vld [vmem:[%s1502_s19 + $0x70] sm:$0xff]  ;;  %v343_v34 = vld [vmem:[%s1496_s27 + $0x10] sm:$0xff] }
  0x92   : > { %v1616_v12 = vadd.s32 %v1509_v3, %v411_v37  ;;  %vm456_vm4 = vcmp.lt.s32.totalorder %v1512_v19, 300  ;;  %v1622_v14 = vadd.s32 %v1509_v3, %v412_v38  ;;  %v1625_v15 = vadd.s32 %v1509_v3, %v413_v40  ;;  %vm1650_vm11 = vmand %vm502_vm3, %vm465_vm2  ;;  %v307_v40 = vld [vmem:[%s1502_s19 + $0x18] sm:$0xff]  ;;  %v344_v47 = vld [vmem:[%s1496_s27 + $0x18] sm:$0xff] }
  0x93   : > { %vm466_vm6 = vcmp.lt.s32.totalorder %v429_v49, 300  ;;  %vm503_vm7 = vcmp.ne.f32.partialorder %v1590_v4, 0.0  ;;  %v1640_v20 = vadd.s32 %v1509_v3, %v414_v41  ;;  %v1643_v21 = vadd.s32 %v1509_v3, %v415_v42  ;;  %vm1669_vm14 = vmand %vm493_vm5, %vm456_vm4  ;;  %v1720_v42 = vld [vmem:[%s1502_s19 + $0x78] sm:$0xff] }
  0x94   : > { %vm457_vm9 = vcmp.lt.s32.totalorder %v1515_v23, 300  ;;  %vm494_vm10 = vcmp.ne.f32.partialorder %v1600_v7, 0.0  ;;  %v1658_v25 = vadd.s32 %v1509_v3, %v416_v44  ;;  %v1661_v26 = vadd.s32 %v1509_v3, %v417_v45  ;;  %vm1681_vm1 = vmand %vm503_vm7, %vm466_vm6  ;;  %v1729_v45 = vld [vmem:[%s1502_s19 + $0x20] sm:$0xff] }
  0x95   : > { %2474 = vst [vmem:[#allocation18_spill] sm:$0xff] %v1643_v21  ;;  %vm467_vm12 = vcmp.lt.s32.totalorder %v1539_v50, 300  ;;  %vm504_vm13 = vcmp.ne.f32.partialorder %v1610_v10, 0.0  ;;  %v2479_v28 = vmov 0  ;;  %vm458_vm15 = vcmp.lt.s32.totalorder %v1518_v27, 300  ;;  %vm1699_vm4 = vmand %vm494_vm10, %vm457_vm9 }
  0x96   : > { %2477 = vst [vmem:[#allocation19_spill] sm:$0xff] %v1658_v25  ;;  %2478 = vst [vmem:[#allocation20_spill] sm:$0xff] %v1661_v26  ;;  %v2480_v28 = vsel %vm1669_vm14, 4294967295, %v2479_v28  ;;  %v567_v19 = vsub.f32 %v1575_v62, %v341_v13  ;;  %v2450_v30 = vmov 0   ;;  %vm468_vm2 = vcmp.lt.s32.totalorder %v1542_v51, 300  ;;  %v1744_v62 = vld [vmem:[%s1502_s19 + $0x80] sm:$0xff] }
  0x97   : > { %2481 = vst [vmem:[#allocation21_spill] sm:$0xff] %v2480_v28  ;;  %v686_v32 = vsel %vm1631_vm8, 1, %v2450_v30  ;;  %vm505_vm3 = vcmp.ne.f32.partialorder %v1636_v17, 0.0  ;;  %v2484_v36 = vmov 0  ;;  %v568_v37 = vsub.f32 %v1600_v7, %v342_v18  ;;  %vm1715_vm9 = vmand %vm504_vm13, %vm467_vm12  ;;  %v1803_v28 = vld [vmem:[%s1502_s19 + $0x90] sm:$0xff]  ;;  %v348_v26 = vld [vmem:[%s1496_s27 + $0x38] sm:$0xff] }
  0x98   : > { %v2485_v36 = vsel %vm1699_vm4, 4294967295, %v2484_v36  ;;  %v687_v38 = vsel %vm1650_vm11, 1, %v2450_v30  ;;  %vm495_vm7 = vcmp.ne.f32.partialorder %v1655_v24, 0.0  ;;  %vm469_vm5 = vcmp.lt.s32.totalorder %v1548_v53, 300  ;;  %vm1738_vm10 = vmand %vm505_vm3, %vm468_vm2 }
  0x99   : > { %2486 = vst [vmem:[#allocation22_spill] sm:$0xff] %v2485_v36  ;;  %v759_v41 = vadd.s32 %v687_v38, %v686_v32  ;;  %vm506_vm6 = vcmp.ne.f32.partialorder %v1674_v29, 0.0  ;;  %v688_v44 = vsel %vm1681_vm1, 1, %v2450_v30  ;;  %vm470_vm12 = vcmp.lt.s32.totalorder %v1551_v54, 300  ;;  %vm1750_vm13 = vmand %vm495_vm7, %vm458_vm15  ;;  %v309_v32 = vld [vmem:[%s1502_s19 + $0x28] sm:$0xff] }
  0x9a   : > { %v569_v49 = vsub.f32 %v1655_v24, %v343_v34  ;;  %v2491_v51 = vmov 0  ;;  %v604_v7 = vsel %vm1669_vm14, %v567_v19, 0.0  ;;  %v605_v13 = vsel %vm1699_vm4, %v568_v37, 0.0  ;;  %v345_v34 = vld [vmem:[%s1496_s27 + $0x20] sm:$0xff]  ;;  %vm1770_vm7 = vmand %vm506_vm6, %vm469_vm5  ;;  %v1778_v37 = vld [vmem:[%s1502_s19 + $0x88] sm:$0xff] }
  0x9b   : > { %v760_v50 = vadd.s32 %v759_v41, %v688_v44  ;;  %v2492_v51 = vsel %vm1750_vm13, 4294967295, %v2491_v51  ;;  %v689_v18 = vsel %vm1715_vm9, 1, %v2450_v30  ;;  %v1775_v19 = vld [vmem:[%s1502_s19 + $0x30] sm:$0xff]  ;;  %vm2496_vm3 = vcmp.ne.f32.partialorder %v1690_v33, 0.0  ;;  %v346_v44 = vld [vmem:[%s1496_s27 + $0x28] sm:$0xff] }
  0x9c   : > { %2493 = vst [vmem:[#allocation23_spill] sm:$0xff] %v2492_v51  ;;  %vm1786_vm0 = vmand %vm2496_vm3, %vm470_vm12  ;;  %v2497_v53 = vmov 0  ;;  %v570_v38 = vsub.f32 %v307_v40, %v344_v47  ;;  %v690_v41 = vsel %vm1738_vm10, 1, %v2450_v30  ;;  %vm2499_vm6 = vcmp.lt.s32.totalorder %v1521_v31, 300 }
  0x9d   : > { %v761_v24 = vadd.s32 %v760_v50, %v689_v18  ;;  %v2498_v53 = vsel %vm1786_vm0, 4294967295, %v2497_v53  ;;  %vm2500_vm2 = vcmp.ne.f32.partialorder %v307_v40, 0.0  ;;  %v2501_v54 = vmov 0 }
  0x9e   : > { %vm1798_vm15 = vmand %vm2500_vm2, %vm2499_vm6  ;;  %v641_v50 = vand.u32 2147483647, %v604_v7  ;;  %v642_v18 = vand.u32 2147483647, %v605_v13  ;;  %vm2504_vm4 = vcmp.lt.s32.totalorder %v1554_v55, 300  ;;  %vm2505_vm5 = vcmp.ne.f32.partialorder %v1720_v42, 0.0 }
  0x9f   : > { %v2502_v54 = vsel %vm1798_vm15, 4294967295, %v2501_v54  ;;  %v762_v36 = vadd.s32 %v761_v24, %v690_v41  ;;  %vm1810_vm14 = vmand %vm2505_vm5, %vm2504_vm4  ;;  %v2506_v31 = vmov 0  ;;  %v571_v40 = vsub.f32 %v1729_v45, %v345_v34  ;;  %v311_v7 = vld [vmem:[%s1502_s19 + $0x38] sm:$0xff]  ;;  %v347_v13 = vld [vmem:[%s1496_s27 + $0x30] sm:$0xff] }
  0xa0   : > { %2503 = vst [vmem:[#allocation24_spill] sm:$0xff] %v2502_v54  ;;  %v2507_v31 = vsel %vm1810_vm14, 4294967295, %v2506_v31  ;;  %v606_v47 = vsel %vm1750_vm13, %v569_v49, 0.0  ;;  %vm2508_vm12 = vcmp.lt.s32.totalorder %v1524_v35, 300  ;;  %vm2509_vm3 = vcmp.ne.f32.partialorder %v1729_v45, 0.0  ;;  %v1836_v24 = vld [vmem:[%s1502_s19 + $0x98] sm:$0xff] }
  0xa1   : > { %vm1825_vm4 = vmand %vm2509_vm3, %vm2508_vm12  ;;  %v2510_v55 = vmov 0  ;;  %v691_v34 = vsel %vm1770_vm7, 1, %v2450_v30  ;;  %v692_v49 = vsel %vm1786_vm0, 1, %v2450_v30  ;;  %vm2512_vm2 = vcmp.lt.s32.totalorder %v1557_v56, 300  ;;  %v1862_v54 = vld [vmem:[%s1502_s19 + $0xa0] sm:$0xff] }
  0xa2   : > { %v2511_v55 = vsel %vm1825_vm4, 4294967295, %v2510_v55  ;;  %vm2513_vm6 = vcmp.ne.f32.partialorder %v1744_v62, 0.0  ;;  %v2514_v35 = vmov 0  ;;  %v572_v45 = vsub.f32 %v309_v32, %v346_v44 }
  0xa3   : > { %vm1843_vm12 = vmand %vm2513_vm6, %vm2512_vm2  ;;  %v607_v41 = vsel %vm1798_vm15, %v570_v38, 0.0  ;;  %v763_v51 = vadd.s32 %v762_v36, %v691_v34  ;;  %vm2516_vm13 = vcmp.lt.s32.totalorder %v1527_v39, 300  ;;  %vm2517_vm5 = vcmp.ne.f32.partialorder %v309_v32, 0.0  ;;  %v350_v34 = vld [vmem:[%s1496_s27 + $0x48] sm:$0xff] }
  0xa4   : > { %v2515_v35 = vsel %vm1843_vm12, 4294967295, %v2514_v35  ;;  %vm1854_vm0 = vmand %vm2517_vm5, %vm2516_vm13  ;;  %v2518_v56 = vmov 0  ;;  %v643_v30 = vand.u32 2147483647, %v606_v47  ;;  %v2521_v25 = vmov 0   ;;  %v349_v47 = vld [vmem:[%s1496_s27 + $0x40] sm:$0xff] }
  0xa5   : > { %v2519_v56 = vsel %vm1854_vm0, 4294967295, %v2518_v56  ;;  %v693_v44 = vsel %vm1810_vm14, 1, %v2521_v25  ;;  %v716_v21 = vadd.f32 %v642_v18, %v641_v50  ;;  %vm2522_vm6 = vcmp.lt.s32.totalorder %v1563_v58, 300 }
  0xa6   : > { %2520 = vst [vmem:[#allocation25_spill] sm:$0xff] %v2519_v56  ;;  %vm2523_vm3 = vcmp.ne.f32.partialorder %v1778_v37, 0.0  ;;  %v573_v36 = vsub.f32 %v1775_v19, %v347_v13  ;;  %v608_v32 = vsel %vm1825_vm4, %v571_v40, 0.0  ;;  %v764_v38 = vadd.s32 %v763_v51, %v692_v49  ;;  %v1890_v51 = vld [vmem:[%s1502_s19 + $0xa8] sm:$0xff]  ;;  %v1916_v56 = vld [vmem:[%s1502_s19 + $0xb0] sm:$0xff] }
  0xa7   : > { %vm1868_vm15 = vmand %vm2523_vm3, %vm2522_vm6  ;;  %vm2526_vm2 = vcmp.lt.s32.totalorder %v1530_v43, 300  ;;  %vm2527_vm14 = vcmp.ne.f32.partialorder %v1775_v19, 0.0  ;;  %v2528_v58 = vmov 0  ;;  %v644_v50 = vand.u32 2147483647, %v607_v41 }
  0xa8   : > { %vm1882_vm3 = vmand %vm2527_vm14, %vm2526_vm2  ;;  %v694_v18 = vsel %vm1843_vm12, 1, %v2521_v25  ;;  %vm2530_vm5 = vcmp.lt.s32.totalorder %v1566_v59, 300  ;;  %vm2531_vm13 = vcmp.ne.f32.partialorder %v1803_v28, 0.0  ;;  %v574_v19 = vsub.f32 %v311_v7, %v348_v26 }
  0xa9   : > { %v2529_v58 = vsel %vm1882_vm3, 4294967295, %v2528_v58  ;;  %vm1897_vm4 = vmand %vm2531_vm13, %vm2530_vm5  ;;  %v609_v40 = vsel %vm1854_vm0, %v572_v45, 0.0  ;;  %v765_v13 = vadd.s32 %v764_v38, %v693_v44  ;;  %vm2534_vm2 = vcmp.lt.s32.totalorder %v1533_v46, 300  ;;  %v1936_v38 = vld [vmem:[%s1502_s19 + $0xb8] sm:$0xff] }
  0xaa   : > { %vm2535_vm6 = vcmp.ne.f32.partialorder %v311_v7, 0.0  ;;  %v2536_v59 = vmov 0  ;;  %v645_v49 = vand.u32 2147483647, %v608_v32  ;;  %v695_v26 = vsel %vm1868_vm15, 1, %v2521_v25 }
  0xab   : > { %vm1908_vm12 = vmand %vm2535_vm6, %vm2534_vm2  ;;  %v717_v41 = vadd.f32 %v716_v21, %v643_v30  ;;  %vm2538_vm5 = vcmp.lt.s32.totalorder %v1569_v60, 300  ;;  %vm2539_vm14 = vcmp.ne.f32.partialorder %v1836_v24, 0.0  ;;  %v575_v7 = vsub.f32 %v1545_v52, %v349_v47  ;;  %v351_v21 = vld [vmem:[%s1496_s27 + $0x50] sm:$0xff] }
  0xac   : > { %v2537_v59 = vsel %vm1908_vm12, 4294967295, %v2536_v59  ;;  %vm1923_vm0 = vmand %vm2539_vm14, %vm2538_vm5  ;;  %v610_v45 = vsel %vm1882_vm3, %v573_v36, 0.0  ;;  %v766_v44 = vadd.s32 %v765_v13, %v694_v18  ;;  %v646_v30 = vand.u32 2147483647, %v609_v40 }
  0xad   : > { %v696_v60 = vsel %vm1897_vm4, 1, %v2521_v25  ;;  %v718_v32 = vadd.f32 %v717_v41, %v644_v50  ;;  %vm2542_vm2 = vcmp.lt.s32.totalorder %v1572_v61, 300  ;;  %vm2543_vm5 = vcmp.ne.f32.partialorder %v1862_v54, 0.0  ;;  %v352_v50 = vld [vmem:[%s1496_s27 + $0x58] sm:$0xff]  ;;  %v1956_v41 = vld [vmem:[%s1502_s19 + $0xc0] sm:$0xff] }
  0xae   : > { %vm1943_vm13 = vmand %vm2543_vm5, %vm2542_vm2  ;;  %v576_v36 = vsub.f32 %v1560_v57, %v350_v34  ;;  %v611_v47 = vsel %vm1908_vm12, %v574_v19, 0.0  ;;  %v767_v18 = vadd.s32 %v766_v44, %v695_v26  ;;  %v647_v40 = vand.u32 2147483647, %v610_v45 }
  0xaf   : > { %v697_v61 = vsel %vm1923_vm0, 1, %v2521_v25  ;;  %v719_v13 = vadd.f32 %v718_v32, %v645_v49  ;;  %vm2546_vm5 = vcmp.lt.s32.totalorder %v1578_v63, 300  ;;  %vm2547_vm14 = vcmp.ne.f32.partialorder %v1890_v51, 0.0  ;;  %v353_v49 = vld [vmem:[%s1496_s27 + $0x60] sm:$0xff]  ;;  %v1976_v32 = vld [vmem:[%s1502_s19 + $0xc8] sm:$0xff] }
  0xb0   : > { %vm1963_vm12 = vmand %vm2547_vm14, %vm2546_vm5  ;;  %v577_v19 = vsub.f32 %v1590_v4, %v351_v21  ;;  %v612_v34 = vsel %vm1631_vm8, %v575_v7, 0.0  ;;  %v768_v26 = vadd.s32 %v767_v18, %v696_v60  ;;  %v648_v45 = vand.u32 2147483647, %v611_v47  ;;  %v1996_v18 = vld [vmem:[%s1502_s19 + $0xd0] sm:$0xff] }
  0xb1   : > { %v698_v63 = vsel %vm1943_vm13, 1, %v2521_v25  ;;  %v720_v44 = vadd.f32 %v719_v13, %v646_v30  ;;  %vm2550_vm5 = vcmp.lt.s32.totalorder %v1581_v0, 300  ;;  %vm2551_vm2 = vcmp.ne.f32.partialorder %v1916_v56, 0.0  ;;  %v354_v30 = vld [vmem:[%s1496_s27 + $0x68] sm:$0xff] }
  0xb2   : > { %vm1983_vm8 = vmand %vm2551_vm2, %vm2550_vm5  ;;  %v578_v16 = vsub.f32 %v1610_v10, %v352_v50  ;;  %v613_v7 = vsel %vm1650_vm11, %v576_v36, 0.0  ;;  %v769_v21 = vadd.s32 %v768_v26, %v697_v61  ;;  %v649_v60 = vand.u32 2147483647, %v612_v34  ;;  %v2016_v34 = vld [vmem:[%s1502_s19 + $0xd8] sm:$0xff] }
  0xb3   : > { %v699_v0 = vsel %vm1963_vm12, 1, %v2521_v25  ;;  %v721_v47 = vadd.f32 %v720_v44, %v647_v40  ;;  %vm2554_vm5 = vcmp.lt.s32.totalorder %v1584_v1, 300  ;;  %vm2555_vm14 = vcmp.ne.f32.partialorder %v1936_v38, 0.0  ;;  %v355_v40 = vld [vmem:[%s1496_s27 + $0x70] sm:$0xff] }
  0xb4   : > { %vm2003_vm11 = vmand %vm2555_vm14, %vm2554_vm5  ;;  %v579_v22 = vsub.f32 %v1636_v17, %v353_v49  ;;  %v614_v36 = vsel %vm1681_vm1, %v577_v19, 0.0  ;;  %v770_v50 = vadd.s32 %v769_v21, %v698_v63  ;;  %v650_v61 = vand.u32 2147483647, %v613_v7  ;;  %v356_v49 = vld [vmem:[%s1496_s27 + $0x78] sm:$0xff]  ;;  %v2036_v44 = vld [vmem:[%s1502_s19 + $0xe0] sm:$0xff] }
  0xb5   : > { %v700_v1 = vsel %vm1983_vm8, 1, %v2521_v25  ;;  %v722_v13 = vadd.f32 %v721_v47, %v648_v45  ;;  %vm2558_vm5 = vcmp.lt.s32.totalorder %v1587_v2, 300  ;;  %vm2559_vm2 = vcmp.ne.f32.partialorder %v1956_v41, 0.0  ;;  %v357_v21 = vld [vmem:[%s1496_s27 + $0x80] sm:$0xff] }
  0xb6   : > { %vm2023_vm1 = vmand %vm2559_vm2, %vm2558_vm5  ;;  %v580_v3 = vsub.f32 %v1674_v29, %v354_v30  ;;  %v615_v19 = vsel %vm1715_vm9, %v578_v16, 0.0  ;;  %v771_v26 = vadd.s32 %v770_v50, %v699_v0  ;;  %v651_v45 = vand.u32 2147483647, %v614_v36  ;;  %v2056_v0 = vld [vmem:[%s1502_s19 + $0xe8] sm:$0xff]  ;;  %v358_v36 = vld [vmem:[%s1496_s27 + $0x88] sm:$0xff] }
  0xb7   : > { %v701_v2 = vsel %vm2003_vm11, 1, %v2521_v25  ;;  %v723_v63 = vadd.f32 %v722_v13, %v649_v60  ;;  %vm2562_vm5 = vcmp.lt.s32.totalorder %v1593_v5, 300  ;;  %vm2563_vm14 = vcmp.ne.f32.partialorder %v1976_v32, 0.0 }
  0xb8   : > { %vm2043_vm9 = vmand %vm2563_vm14, %vm2562_vm5  ;;  %v581_v23 = vsub.f32 %v1690_v33, %v355_v40  ;;  %v616_v16 = vsel %vm1738_vm10, %v579_v22, 0.0  ;;  %v772_v7 = vadd.s32 %v771_v26, %v700_v1  ;;  %v652_v30 = vand.u32 2147483647, %v615_v19 }
  0xb9   : > { %v702_v5 = vsel %vm2023_vm1, 1, %v2521_v25  ;;  %v724_v60 = vadd.f32 %v723_v63, %v650_v61  ;;  %vm2566_vm5 = vcmp.lt.s32.totalorder %v1596_v6, 300  ;;  %vm2567_vm2 = vcmp.ne.f32.partialorder %v1996_v18, 0.0  ;;  %v2076_v61 = vld [vmem:[%s1502_s19 + $0xf0] sm:$0xff]  ;;  %v360_v63 = vld [vmem:[%s1496_s27 + $0x98] sm:$0xff] }
  0xba   : > { %vm2063_vm10 = vmand %vm2567_vm2, %vm2566_vm5  ;;  %v2568_v33 = vmov 0  ;;  %v582_v48 = vsub.f32 %v1720_v42, %v356_v49  ;;  %v617_v47 = vsel %vm1770_vm7, %v580_v3, 0.0  ;;  %v773_v22 = vadd.s32 %v772_v7, %v701_v2  ;;  %v359_v3 = vld [vmem:[%s1496_s27 + $0x90] sm:$0xff]  ;;  %v2096_v49 = vld [vmem:[%s1502_s19 + $0xf8] sm:$0xff] }
  0xbb   : > { %v2569_v33 = vsel %vm2063_vm10, 4294967295, %v2568_v33  ;;  %v653_v50 = vand.u32 2147483647, %v616_v16  ;;  %v703_v6 = vsel %vm2043_vm9, 1, %v2521_v25  ;;  %v725_v40 = vadd.f32 %v724_v60, %v651_v45  ;;  %v2116_v7 = vld [vmem:[%s1502_s19 + $0x100] sm:$0xff] }
  0xbc   : > { %vm2570_vm5 = vcmp.lt.s32.totalorder %v1603_v8, 300  ;;  %vm2571_vm14 = vcmp.ne.f32.partialorder %v2016_v34, 0.0  ;;  %v2572_v42 = vmov 0  ;;  %v583_v27 = vsub.f32 %v1744_v62, %v357_v21  ;;  %v374_v62 = vld [vmem:[%s1496_s27 + $0x108] sm:$0xff] }
  0xbd   : > { %vm2083_vm7 = vmand %vm2571_vm14, %vm2570_vm5  ;;  %vm2574_vm6 = vnez %v2498_v53  ;;  %v774_v13 = vadd.s32 %v773_v22, %v702_v5  ;;  %v654_v19 = vand.u32 2147483647, %v617_v47  ;;  %v704_v8 = vsel %vm2063_vm10, 1, %v2521_v25  ;;  %v361_v5 = vld [vmem:[%s1496_s27 + $0xa0] sm:$0xff]  ;;  %v2136_v47 = vld [vmem:[%s1502_s19 + $0x108] sm:$0xff] }
  0xbe   : > { %v2573_v42 = vsel %vm2083_vm7, 4294967295, %v2572_v42  ;;  %v618_v1 = vsel %vm2574_vm6, %v581_v23, 0.0  ;;  %v726_v26 = vadd.f32 %v725_v40, %v652_v30  ;;  %vm2575_vm5 = vcmp.lt.s32.totalorder %v1606_v9, 300 }
  0xbf   : > { %vm2576_vm2 = vcmp.ne.f32.partialorder %v2036_v44, 0.0  ;;  %v584_v53 = vsub.f32 %v1778_v37, %v358_v36  ;;  %vm2579_vm3 = vnez %v2507_v31  ;;  %v775_v2 = vadd.s32 %v774_v13, %v703_v6 }
  0xc0   : > { %vm2103_vm6 = vmand %vm2576_vm2, %vm2575_vm5  ;;  %v619_v45 = vsel %vm2579_vm3, %v582_v48, 0.0  ;;  %v655_v23 = vand.u32 2147483647, %v618_v1  ;;  %v705_v9 = vsel %vm2083_vm7, 1, %v2521_v25  ;;  %v727_v16 = vadd.f32 %v726_v26, %v653_v50  ;;  %v362_v50 = vld [vmem:[%s1496_s27 + $0xa8] sm:$0xff] }
  0xc1   : > { %vm2580_vm5 = vcmp.lt.s32.totalorder %v1613_v11, 300  ;;  %vm2581_vm14 = vcmp.ne.f32.partialorder %v2056_v0, 0.0  ;;  %v585_v31 = vsub.f32 %v1803_v28, %v359_v3  ;;  %vm2584_vm10 = vnez %v2515_v35  ;;  %v363_v3 = vld [vmem:[%s1496_s27 + $0xb0] sm:$0xff]  ;;  %v2176_v26 = vld [vmem:[%s1502_s19 + $0x118] sm:$0xff] }
  0xc2   : > { %vm2123_vm3 = vmand %vm2581_vm14, %vm2580_vm5  ;;  %v620_v21 = vsel %vm2584_vm10, %v583_v27, 0.0  ;;  %v776_v30 = vadd.s32 %v775_v2, %v704_v8  ;;  %v656_v60 = vand.u32 2147483647, %v619_v45  ;;  %v706_v11 = vsel %vm2103_vm6, 1, %v2521_v25  ;;  %v2156_v27 = vld [vmem:[%s1502_s19 + $0x110] sm:$0xff] }
  0xc3   : > { %v728_v48 = vadd.f32 %v727_v16, %v654_v19  ;;  %vm2585_vm5 = vcmp.lt.s32.totalorder %v1616_v12, 300  ;;  %vm2586_vm2 = vcmp.ne.f32.partialorder %v2076_v61, 0.0  ;;  %v586_v35 = vsub.f32 %v1836_v24, %v360_v63  ;;  %v364_v63 = vld [vmem:[%s1496_s27 + $0xb8] sm:$0xff]  ;;  %v2196_v16 = vld [vmem:[%s1502_s19 + $0x120] sm:$0xff] }
  0xc4   : > { %vm2143_vm10 = vmand %vm2586_vm2, %vm2585_vm5  ;;  %v621_v22 = vsel %vm1868_vm15, %v584_v53, 0.0  ;;  %v777_v36 = vadd.s32 %v776_v30, %v705_v9  ;;  %v657_v6 = vand.u32 2147483647, %v620_v21  ;;  %v707_v12 = vsel %vm2123_vm3, 1, %v2521_v25  ;;  %v2593_v53 = vld [vmem:[#allocation18_spill] sm:$0xff] }
  0xc5   : > { %v729_v40 = vadd.f32 %v728_v48, %v655_v23  ;;  %vm2589_vm5 = vcmp.lt.s32.totalorder %v1622_v14, 300  ;;  %vm2590_vm14 = vcmp.ne.f32.partialorder %v2096_v49, 0.0  ;;  %v2591_v24 = vmov 0  ;;  %v2603_v48 = vld [vmem:[#allocation20_spill] sm:$0xff] }
  0xc6   : > { %vm2163_vm15 = vmand %vm2590_vm14, %vm2589_vm5  ;;  %v587_v39 = vsub.f32 %v1862_v54, %v361_v5  ;;  %v622_v1 = vsel %vm1897_vm4, %v585_v31, 0.0  ;;  %v778_v13 = vadd.s32 %v777_v36, %v706_v11  ;;  %v658_v19 = vand.u32 2147483647, %v621_v22  ;;  %v2598_v31 = vld [vmem:[#allocation19_spill] sm:$0xff] }
  0xc7   : > { %v2592_v24 = vsel %vm2163_vm15, 4294967295, %v2591_v24  ;;  %v708_v14 = vsel %vm2143_vm10, 1, %v2521_v25  ;;  %v730_v8 = vadd.f32 %v729_v40, %v656_v60  ;;  %vm2594_vm5 = vcmp.lt.s32.totalorder %v1625_v15, 300  ;;  %v365_v5 = vld [vmem:[%s1496_s27 + $0xc0] sm:$0xff]  ;;  %v366_v36 = vld [vmem:[%s1496_s27 + $0xc8] sm:$0xff] }
  0xc8   : > { %vm2595_vm2 = vcmp.ne.f32.partialorder %v2116_v7, 0.0  ;;  %v588_v43 = vsub.f32 %v1890_v51, %v362_v50  ;;  %v623_v45 = vsel %vm1923_vm0, %v586_v35, 0.0  ;;  %v779_v2 = vadd.s32 %v778_v13, %v707_v12 }
  0xc9   : > { %vm2183_vm4 = vmand %vm2595_vm2, %vm2594_vm5  ;;  %v659_v23 = vand.u32 2147483647, %v622_v1  ;;  %v709_v15 = vsel %vm2163_vm15, 1, %v2521_v25  ;;  %v731_v9 = vadd.f32 %v730_v8, %v657_v6  ;;  %vm2599_vm5 = vcmp.lt.s32.totalorder %v1640_v20, 300  ;;  %v367_v1 = vld [vmem:[%s1496_s27 + $0xd0] sm:$0xff] }
  0xca   : > { %vm2600_vm14 = vcmp.ne.f32.partialorder %v2136_v47, 0.0  ;;  %v589_v46 = vsub.f32 %v1916_v56, %v363_v3  ;;  %v624_v21 = vsel %vm1943_vm13, %v587_v39, 0.0  ;;  %v780_v30 = vadd.s32 %v779_v2, %v708_v14  ;;  %v2613_v8 = vld [vmem:[#allocation21_spill] sm:$0xff] }
  0xcb   : > { %vm2203_vm0 = vmand %vm2600_vm14, %vm2599_vm5  ;;  %vm528_vm7 = vcmp.ne.f32.partialorder %v2176_v26, 0.0  ;;  %v660_v60 = vand.u32 2147483647, %v623_v45  ;;  %v710_v20 = vsel %vm2183_vm4, 1, %v2521_v25  ;;  %v732_v11 = vadd.f32 %v731_v9, %v658_v19  ;;  %v368_v45 = vld [vmem:[%s1496_s27 + $0xd8] sm:$0xff] }
  0xcc   : > { %vm492_vm14 = vcmp.lt.s32.totalorder %v2603_v48, 300  ;;  %vm2604_vm5 = vcmp.lt.s32.totalorder %v2593_v53, 300  ;;  %vm2605_vm2 = vcmp.ne.f32.partialorder %v2156_v27, 0.0  ;;  %v590_v52 = vsub.f32 %v1936_v38, %v364_v63  ;;  %v2616_v9 = vld [vmem:[#allocation22_spill] sm:$0xff] }
  0xcd   : > { %vm2220_vm15 = vmand %vm2605_vm2, %vm2604_vm5  ;;  %v625_v35 = vsel %vm1963_vm12, %v588_v43, 0.0  ;;  %v781_v22 = vadd.s32 %v780_v30, %v709_v15  ;;  %vm529_vm13 = vcmp.ne.f32.partialorder %v2196_v16, 0.0  ;;  %v661_v50 = vand.u32 2147483647, %v624_v21  ;;  %v2618_v30 = vld [vmem:[#allocation25_spill] sm:$0xff] }
  0xce   : > { %v711_v6 = vsel %vm2203_vm0, 1, %v2521_v25  ;;  %v733_v12 = vadd.f32 %v732_v11, %v659_v23  ;;  %vm2608_vm2 = vcmp.lt.s32.totalorder %v2598_v31, 300  ;;  %v591_v38 = vsub.f32 %v1956_v41, %v365_v5  ;;  %vm2247_vm12 = vmand %vm529_vm13, %vm492_vm14 }
  0xcf   : > { %vm2234_vm5 = vmand %vm528_vm7, %vm2608_vm2  ;;  %v626_v57 = vsel %vm1983_vm8, %v589_v46, 0.0  ;;  %v782_v39 = vadd.s32 %v781_v22, %v710_v20  ;;  %v662_v13 = vand.u32 2147483647, %v625_v35  ;;  %v712_v3 = vsel %vm2220_vm15, 1, %v2521_v25  ;;  %v369_v46 = vld [vmem:[%s1496_s27 + $0xe0] sm:$0xff] }
  0xd0   : > { %v734_v19 = vadd.f32 %v733_v12, %v660_v60  ;;  %v592_v41 = vsub.f32 %v1976_v32, %v366_v36  ;;  %v627_v4 = vsel %vm2003_vm11, %v590_v52, 0.0  ;;  %vm2614_vm8 = vnez %v2613_v8  ;;  %v370_v52 = vld [vmem:[%s1496_s27 + $0xe8] sm:$0xff] }
  0xd1   : > { %v678_v53 = vsel %vm2614_vm8, 1, %v2521_v25  ;;  %v783_v43 = vadd.s32 %v782_v39, %v711_v6  ;;  %v663_v2 = vand.u32 2147483647, %v626_v57  ;;  %vm2615_vm7 = vnez %v2511_v55  ;;  %v2620_v22 = vld [vmem:[#allocation23_spill] sm:$0xff]  ;;  %v371_v57 = vld [vmem:[%s1496_s27 + $0xf0] sm:$0xff] }
  0xd2   : > { %v682_v63 = vsel %vm2615_vm7, 1, %v2521_v25  ;;  %v713_v23 = vsel %vm2234_vm5, 1, %v2521_v25  ;;  %v735_v15 = vadd.f32 %v734_v19, %v661_v50  ;;  %v593_v32 = vsub.f32 %v1996_v18, %v367_v1  ;;  %v2624_v1 = vld [vmem:[#allocation24_spill] sm:$0xff] }
  0xd3   : > { %v628_v10 = vsel %vm2023_vm1, %v591_v38, 0.0  ;;  %vm2617_vm11 = vnez %v2616_v9  ;;  %v784_v55 = vadd.s32 %v783_v43, %v712_v3  ;;  %v664_v21 = vand.u32 2147483647, %v627_v4  ;;  %v372_v4 = vld [vmem:[%s1496_s27 + $0xf8] sm:$0xff] }
  0xd4   : > { %v679_v31 = vsel %vm2617_vm11, 1, %v2521_v25  ;;  %vm2619_vm14 = vnez %v2618_v30  ;;  %v714_v60 = vsel %vm2247_vm12, 1, %v2521_v25  ;;  %v736_v18 = vadd.f32 %v735_v15, %v662_v13 }
  0xd5   : > { %v683_v5 = vsel %vm2619_vm14, 1, %v2521_v25  ;;  %v594_v17 = vsub.f32 %v2016_v34, %v368_v45  ;;  %v629_v20 = vsel %vm2043_vm9, %v592_v41, 0.0  ;;  %v785_v11 = vadd.s32 %v784_v55, %v713_v23 }
  0xd6   : > { %v755_v48 = vadd.s32 %v682_v63, %v678_v53  ;;  %v665_v35 = vand.u32 2147483647, %v628_v10  ;;  %vm2621_vm1 = vnez %v2620_v22  ;;  %vm2622_vm13 = vnez %v2529_v58 }
  0xd7   : > { %v680_v36 = vsel %vm2621_vm1, 1, %v2521_v25  ;;  %v684_v50 = vsel %vm2622_vm13, 1, %v2521_v25  ;;  %v737_v6 = vadd.f32 %v736_v18, %v663_v2  ;;  %v595_v34 = vsub.f32 %v2036_v44, %v369_v46  ;;  %v373_v2 = vld [vmem:[%s1496_s27 + $0x100] sm:$0xff]  ;;  %v376_v46 = vld [vmem:[%s1496_s27 + $0x118] sm:$0xff] }
  0xd8   : > { %vm2623_vm2 = vnez %v2569_v33  ;;  %v786_v12 = vadd.s32 %v785_v11, %v714_v60  ;;  %v756_v38 = vadd.s32 %v683_v5, %v679_v31  ;;  %v666_v39 = vand.u32 2147483647, %v629_v20 }
  0xd9   : > { %v630_v29 = vsel %vm2623_vm2, %v593_v32, 0.0  ;;  %vm2625_vm9 = vnez %v2624_v1  ;;  %vm2626_vm8 = vnez %v2537_v59  ;;  %v738_v3 = vadd.f32 %v737_v6, %v664_v21 }
  0xda   : > { %v681_v13 = vsel %vm2625_vm9, 1, %v2521_v25  ;;  %v685_v58 = vsel %vm2626_vm8, 1, %v2521_v25  ;;  %v596_v44 = vsub.f32 %v2056_v0, %v370_v52  ;;  %vm2627_vm7 = vnez %v2573_v42 }
  0xdb   : > { %v631_v33 = vsel %vm2627_vm7, %v594_v17, 0.0  ;;  %v787_v19 = vadd.s32 %v786_v12, %v755_v48  ;;  %v757_v41 = vadd.s32 %v684_v50, %v680_v36  ;;  %v667_v8 = vand.u32 2147483647, %v630_v29 }
  0xdc   : > { %v739_v53 = vadd.f32 %v738_v3, %v665_v35  ;;  %v597_v43 = vsub.f32 %v2076_v61, %v371_v57  ;;  %v632_v59 = vsel %vm2103_vm6, %v595_v34, 0.0  ;;  %v758_v45 = vadd.s32 %v685_v58, %v681_v13 }
  0xdd   : > { %v788_v25 = vadd.s32 %v787_v19, %v756_v38  ;;  %v668_v63 = vand.u32 2147483647, %v631_v33  ;;  %v598_v42 = vsub.f32 %v2096_v49, %v372_v4  ;;  %v633_v23 = vsel %vm2123_vm3, %v596_v44, 0.0  ;;  %v375_v49 = vld [vmem:[%s1496_s27 + $0x110] sm:$0xff] }
  0xde   : > { %v740_v0 = vadd.f32 %v739_v53, %v666_v39  ;;  %v669_v15 = vand.u32 2147483647, %v632_v59  ;;  %v599_v10 = vsub.f32 %v2116_v7, %v373_v2  ;;  %v634_v9 = vsel %vm2143_vm10, %v597_v43, 0.0 }
  0xdf   : > { %v789_v61 = vadd.s32 %v788_v25, %v757_v41  ;;  %v670_v37 = vand.u32 2147483647, %v633_v23  ;;  %v600_v7 = vsub.f32 %v2136_v47, %v374_v62  ;;  %vm2628_vm6 = vnez %v2592_v24 }
  0xe0   : > { %v741_v32 = vadd.f32 %v740_v0, %v667_v8  ;;  %v635_v28 = vsel %vm2628_vm6, %v598_v42, 0.0  ;;  %v671_v21 = vand.u32 2147483647, %v634_v9 }
  0xe1   : > { %v790_v31 = vadd.s32 %v789_v61, %v758_v45 }
  0xe2   : > { %v742_v55 = vadd.f32 %v741_v32, %v668_v63 }
  0xe3   : > { %799 = vst [vmem:[%s281_s10] sm:$0xff] %v790_v31 }
  0xe4   : > { %v743_v30 = vadd.f32 %v742_v55, %v669_v15 }
  0xe5   : > { %1153 = shalt.err (!%p1150_p2)
}
  0xe6   : > { %s1154_s19 = scalar_lea.hbm %s2324_s30, 128  ;;  %s1158_s26 = scalar_lea.hbm %s2437_s3, 256 }
  0xe7   : > { %p1155_p3 = scmp.ne.s32.totalorder %s2324_s30, %s1154_s19  ;;  %p1159_p5 = scmp.lt.u32.totalorder %s2324_s30, %s2437_s3 }
  0xe8   : > { %p1160_p4 = scmp.lt.u32.totalorder %s1158_s26, %s1154_s19  ;;  %p1162_p8 = scmp.lt.u32.totalorder %s1154_s19, %s2324_s30 }
  0xe9   : > { %p1156_p10 = pnand %p1155_p3, %p2629_p6 }
  0xea   : > { %p1161_p7 = por %p1160_p4, %p1159_p5 }
  0xeb   : > { %p1157_p0 = pneg %p1156_p10 }
  0xec   : > { %p1163_p9 = por %p1162_p8, %p1161_p7 }
  0xee   : > { %p1164_p11 = pnand %p1163_p9, %p1157_p0 }
  0xf0   : > { %1167 = shalt.err (!%p1164_p11)
}
  0xf1   : > { %996 = dma.vmem_to_hbm [thread:$0]  (%p2629_p6), %s2326_s23, 128, %s2324_s30, %s806_s11   ;;  %v601_v47 = vsub.f32 %v2156_v27, %v375_v49  ;;  %v636_v24 = vsel %vm2183_vm4, %v599_v10, 0.0  ;;  %v377_v5 = vld [vmem:[%s1496_s27 + $0x120] sm:$0xff]  ;;  %v672_v60 = vand.u32 2147483647, %v635_v28  ;;  %v744_v18 = vadd.f32 %v743_v30, %v670_v37 }
  0xf2   : > { %v602_v17 = vsub.f32 %v2176_v26, %v376_v46  ;;  %v637_v20 = vsel %vm2203_vm0, %v600_v7, 0.0  ;;  %v673_v11 = vand.u32 2147483647, %v636_v24  ;;  %v603_v52 = vsub.f32 %v2196_v16, %v377_v5  ;;  %s274_s27 = scalar_lea.vmem [#allocation9], %s980_s9  ;;  %s2376_s15 = scalar_lea.hbm %s2436_s2, %s984_s29 }
  0xf3   : > { %v745_v48 = vadd.f32 %v744_v18, %v671_v21  ;;  %v638_v27 = vsel %vm2220_vm15, %v601_v47, 0.0  ;;  %v674_v35 = vand.u32 2147483647, %v637_v20  ;;  %s819_s23 = sshll.u32 %s274_s27, 4  ;;  %s801_s25 = scalar_lea.sflag [#allocation6], %s2265_s28  ;;  %s2378_s23 = int_to_ptr.vmem [resolvable:$true] %s819_s23 }
  0xf4   : > { %v639_v22 = vsel %vm2234_vm5, %v602_v17, 0.0  ;;  %v675_v36 = vand.u32 2147483647, %v638_v27  ;;  %v640_v51 = vsel %vm2247_vm12, %v603_v52, 0.0  ;;  %s1168_s4 = scalar_lea.vmem %s2378_s23, 128  ;;  %s1292_s9 = smov [#allocation9]  }
  0xf5   : > { %v746_v54 = vadd.f32 %v745_v48, %v672_v60  ;;  %v676_v50 = vand.u32 2147483647, %v639_v22  ;;  %v677_v34 = vand.u32 2147483647, %v640_v51  ;;  %p1169_p12 = scmp.ne.s32.totalorder %s2378_s23, %s1168_s4  ;;  %s1172_s19 = sshll.u32 %s1292_s9, 4  ;;  %s1173_s19 = int_to_ptr.vmem [resolvable:$false] %s1172_s19 }
  0xf6   : > { %s1174_s18 = scalar_lea.vmem %s1173_s19, 256  ;;  %p1175_p2 = scmp.lt.s32.totalorder %s2378_s23, %s1173_s19 }
  0xf7   : > { %v747_v26 = vadd.f32 %v746_v54, %v673_v11  ;;  %p1170_p13 = pnand %p1169_p12, %p2629_p6  ;;  %p1176_p3 = scmp.lt.s32.totalorder %s1174_s18, %s1168_s4 }
  0xf9   : > { %v748_v6 = vadd.f32 %v747_v26, %v674_v35  ;;  %p1171_p1 = pneg %p1170_p13  ;;  %p1177_p10 = por %p1176_p3, %p1175_p2 }
  0xfb   : > { %v749_v16 = vadd.f32 %v748_v6, %v675_v36  ;;  %p1178_p0 = pnand %p1177_p10, %p1171_p1 }
  0xfd   : > { %v750_v56 = vadd.f32 %v749_v16, %v676_v50 }
  0xff   : > { %v751_v29 = vadd.f32 %v750_v56, %v677_v34 }
 0x101   : > { %797 = vst [vmem:[%s274_s27] sm:$0xff] %v751_v29 }
 0x102   : > { %1181 = shalt.err (!%p1178_p0)
}
 0x103   : > { %s1182_s28 = scalar_lea.hbm %s2376_s15, 128  ;;  %s1186_s10 = scalar_lea.hbm %s2436_s2, 256 }
 0x104   : > { %p1183_p5 = scmp.ne.s32.totalorder %s2376_s15, %s1182_s28  ;;  %p1187_p8 = scmp.lt.u32.totalorder %s2376_s15, %s2436_s2 }
 0x105   : > { %p1188_p9 = scmp.lt.u32.totalorder %s1186_s10, %s1182_s28  ;;  %p1190_p12 = scmp.lt.u32.totalorder %s1182_s28, %s2376_s15 }
 0x106   : > { %p1184_p4 = pnand %p1183_p5, %p2629_p6 }
 0x107   : > { %p1189_p11 = por %p1188_p9, %p1187_p8 }
 0x108   : > { %p1185_p7 = pneg %p1184_p4 }
 0x109   : > { %p1191_p13 = por %p1190_p12, %p1189_p11 }
 0x10b   : > { %p1192_p1 = pnand %p1191_p13, %p1185_p7 }
 0x10d   : > { %1195 = shalt.err (!%p1192_p1)
}
 0x10e   : > { %995 = dma.vmem_to_hbm [thread:$0]  (%p2629_p6), %s2378_s23, 128, %s2376_s15, %s801_s25  }
 0x10f PF: > { %s844_s22 = sand.u32 1, %s1250_s12   ;;  %p2630_p2 = scmp.ne.s32.totalorder %s2471_s8, 0 }
 0x110   : > { %p2631_p3 = scmp.ge.s32.totalorder %s1282_s20, 2  ;;  %s845_s27 = scalar_lea.sflag [#allocation6], %s844_s22 }
 0x112   : > { %p1000_p10 = pnand %p2631_p3, %p2630_p2 }
 0x114   : > { %1241 = dma.done.wait (!%p1000_p10), %s845_s27, 128  }
 0x115   : > { %1243 = vsyncadd (!%p1000_p10), %s845_s27, 4294967168  ;;  %s854_s30 = scalar_lea.sflag [#allocation11], %s844_s22 }
 0x116   : > { %1245 = dma.done.wait (!%p1000_p10), %s854_s30, 128  }
 0x117   : > { %1247 = vsyncadd (!%p1000_p10), %s854_s30, 4294967168  ;;  %s26_s20 = sadd.s32 1, %s1282_s20   ;;  %s2632_s18 = sld [smem:[#allocation16_spill]] }
 0x118   : > { %p23_p0 = scmp.ge.s32.totalorder %s26_s20, 4   ;;  %s2633_s19 = sld [smem:[#allocation17_spill]] }
 0x119   : > { %s2634_s12 = smov %s1254_s13  ;;  %s2635_s13 = smov %s1258_s14 }
 0x11a   : > { %s2636_s14 = smov %s1385_s5  ;;  %s2637_s15 = smov %s1266_s16 }
 0x11b   : > { %s2638_s16 = smov %s1270_s17  ;;  %s2639_s17 = smov %s1388_s6 }
 0x11c   :  { %25 = sbr.rel (!%p23_p0) target bundleno = 12 (0xc), region = 111 }
 0x123   :  { %859 = vsyncpa [#allocation5], 1 }
 0x124   :  { %861 = vsyncpa [#allocation5 + $0x1], 1 }
 0x125   :  { %862 = vsyncpa [#allocation8], 1 }
 0x126   :  { %864 = vsyncpa [#allocation8 + $0x1], 1 }
 0x127   :  { %865 = vsyncpa [#allocation6], 1 }
 0x128   :  { %867 = vsyncpa [#allocation6 + $0x1], 1 }
 0x129   :  { %868 = vsyncpa [#allocation11], 1 }
 0x12a   :  { %870 = vsyncpa [#allocation11 + $0x1], 1 }

</bundles_post_ra>
